<compile_context>
chip_gen: v7x
topology: tpu7x:2x2x1
jax: 0.10.0
libtpu: 0.0.40
codegen_flags: <defaults>
</compile_context>

<pallas_src>
import numpy as np
import jax
import jax.numpy as jnp
from jax.experimental import pallas as pl
from jax.experimental.pallas import tpu as pltpu


# --------------------------- bilinear resize consts --------------------------- #

def _bilinear_matrix(out_size, in_size):
    """(out_size, in_size) matrix A so that `resized = A @ x` along that axis,
    matching F.interpolate(mode='bilinear', align_corners=False)."""
    if out_size == in_size:
        return np.eye(out_size, dtype=np.float32)
    scale = in_size / out_size
    src = (np.arange(out_size, dtype=np.float64) + 0.5) * scale - 0.5
    src = np.maximum(src, 0.0)                         # PyTorch clamps negatives to 0
    i0 = np.minimum(np.floor(src).astype(np.int64), in_size - 1)
    i1 = np.minimum(i0 + 1, in_size - 1)
    w1 = (src - i0).astype(np.float32)
    a = np.zeros((out_size, in_size), np.float32)
    rows = np.arange(out_size)
    a[rows, i0] += 1.0 - w1
    a[rows, i1] += w1
    return a


# ------------------------------ sizing heuristics ------------------------------ #

def _vmem_capacity():
    """Per-core VMEM bytes; conservative 64 MiB (v7x) default if the query fails."""
    try:
        return int(pltpu.get_tpu_info().vmem_capacity_bytes)
    except Exception:
        return 64 << 20


def _pick_row_tile(H, W, *, bytes_per_px, batch, vmem_cap, min_points=4):
    """Rows-per-tile for tiling the flattened H*W pixel axis.  th*W must be a
    multiple of 128 (lane-dense blocks/stores) unless the tile covers the whole
    image.  Tile size is derived from the device VMEM budget; we also prefer a
    tiling with >= min_points grid points so both v7x TensorCores get work."""
    budget = min(vmem_cap // 4, 32 << 20)          # per-step streamed-block budget
    max_thw = int(np.clip(budget // max(bytes_per_px, 1), 128, 8192))
    cands = [t for t in range(1, H + 1)
             if H % t == 0 and (t * W) % 128 == 0 and t * W <= max_thw]
    if not cands:
        return H                                   # tiny map: one full-image tile
    pref = [t for t in cands if batch * (H // t) >= min_points]
    return max(pref) if pref else max(cands)


def _vmem_limit(per_step_bytes, vmem_cap):
    need = int(2 * per_step_bytes * 1.25) + (2 << 20)   # double-buffer + headroom
    cap = (40 << 20) if vmem_cap <= (64 << 20) else (96 << 20)
    return int(min(max(need, 8 << 20), cap))


# ------------------------------- Pallas kernel -------------------------------- #

def _proj_add_kernel(clip_ref, w_ref, sam_ref, out_ref):
    """Fused 1x1-conv projection of the clip tile + add of the pre-resized SAM tile.

    clip_ref: (1, Cin, T)   w_ref: (Cout, Cin)   sam_ref/out_ref: (1, Cout, T)
    T is lane-dense (multiple of 128, or the full pixel axis)."""
    # TODO(synk): for tiny Cin (<~32) a VPU broadcast-MAC over Cin would beat the
    # underfilled MXU; real CLIP dims (768/1024) keep the MXU path optimal.
    proj = jnp.dot(w_ref[...], clip_ref[0], preferred_element_type=jnp.float32)
    out_ref[0] = (proj + sam_ref[0].astype(jnp.float32)).astype(out_ref.dtype)


def _proj_add_call(clip2d, w_c, sam2d, *, T, out_dtype, vmem_cap):
    B, Cin, HW = clip2d.shape
    Cout = int(w_c.shape[0])
    n_tiles = HW // T

    csz = np.dtype(clip2d.dtype).itemsize
    ssz = np.dtype(sam2d.dtype).itemsize
    osz = np.dtype(out_dtype).itemsize
    per_step = T * (Cin * csz + Cout * ssz + Cout * osz) + Cout * Cin * csz

    grid_spec = pltpu.PrefetchScalarGridSpec(
        num_scalar_prefetch=0,
        grid=(B, n_tiles),
        in_specs=[
            pl.BlockSpec((1, Cin, T), lambda b, i: (b, 0, i)),    # clip tile (streamed)
            pl.BlockSpec((Cout, Cin), lambda b, i: (0, 0)),       # weight (resident)
            pl.BlockSpec((1, Cout, T), lambda b, i: (b, 0, i)),   # resized SAM tile
        ],
        out_specs=pl.BlockSpec((1, Cout, T), lambda b, i: (b, 0, i)),
    )
    return pl.pallas_call(
        _proj_add_kernel,
        out_shape=jax.ShapeDtypeStruct((B, Cout, HW), out_dtype),
        grid_spec=grid_spec,
        compiler_params=pltpu.CompilerParams(
            dimension_semantics=("parallel", "parallel"),
            vmem_limit_bytes=_vmem_limit(per_step, vmem_cap)),
    )(clip2d, w_c, sam2d)


# ----------------------------------- module ----------------------------------- #

class SAMFeatureFusionPallas:
    """Pallas port of SAMFeatureFusion (fusion_type='add')."""

    def __init__(self, sam_dim=256, clip_dims=None, fusion_type='add', key=None,
                 compute_dtype=jnp.bfloat16):
        if fusion_type != 'add':
            # TODO(synk): 'concat' path lazily creates Conv2d layers at forward time
            # (stateful module mutation); not implemented here.
            raise NotImplementedError("only fusion_type='add' is implemented")
        self.sam_dim = sam_dim
        self.fusion_type = fusion_type
        self.compute_dtype = compute_dtype
        self.projections = None
        if clip_dims is not None:
            self.projections = {}
            key = jax.random.PRNGKey(0) if key is None else key
            for k, dim in sorted(clip_dims.items()):
                key, sub = jax.random.split(key)
                bound = 1.0 / np.sqrt(dim)   # Conv2d default init, fan_in = dim*1*1
                # weight of nn.Conv2d(dim, sam_dim, 1, bias=False): (sam_dim, dim)
                self.projections[k] = jax.random.uniform(
                    sub, (sam_dim, dim), jnp.float32, minval=-bound, maxval=bound)
        self._w_cache = {}        # key -> compute-dtype weight
        self._resize_cache = {}   # (H, W, Hin, Win) -> (Ah, AwT) f32

    def _get_weight(self, key):
        if key not in self._w_cache:
            self._w_cache[key] = self.projections[key].astype(self.compute_dtype)
        return self._w_cache[key]

    def _get_resize_consts(self, H, W, Hin, Win):
        ck = (H, W, Hin, Win)
        if ck not in self._resize_cache:
            Ah = jnp.asarray(_bilinear_matrix(H, Hin))        # (H, Hin)
            AwT = jnp.asarray(_bilinear_matrix(W, Win).T)     # (Win, W)
            self._resize_cache[ck] = (Ah, AwT)
        return self._resize_cache[ck]

    def __call__(self, sam_features, clip_features):
        B, Cs, Hin, Win = sam_features.shape
        cdt = self.compute_dtype
        vmem_cap = _vmem_capacity()

        sam_f32 = sam_features.astype(jnp.float32)
        resized_cache = {}   # per-forward: (H, W) -> f32 (B, Cs, H, W), shared by levels

        def get_sam_resized(H, W):
            if (H, W) == (Hin, Win):
                return sam_f32
            if (H, W) not in resized_cache:
                # Separable bilinear resize in plain jnp (f32), ONCE per target size:
                # tile-invariant work hoisted out of the Pallas grid (perf review #1/#2).
                Ah, AwT = self._get_resize_consts(H, W, Hin, Win)
                y = jnp.einsum("uh,bchw->bcuw", Ah, sam_f32)
                y = jnp.einsum("bcuw,wv->bcuv", y, AwT)
                resized_cache[(H, W)] = y
            return resized_cache[(H, W)]

        fused = {}
        for key, clip_feat in clip_features.items():
            Bc, Cc, H, W = clip_feat.shape
            needs_proj = (Cc != self.sam_dim) and (self.projections is not None)

            # Mirror the PyTorch try/except fallback: on incompatibility return clip.
            if needs_proj and key not in self.projections:
                print(f"警告: 特征融合失败: no projection layer for '{key}'")
                fused[key] = clip_feat
                continue
            if needs_proj and Cs != self.sam_dim:
                print(f"警告: 特征融合失败: sam channels {Cs} != sam_dim {self.sam_dim}")
                fused[key] = clip_feat
                continue
            if not needs_proj and Cc != Cs:
                print(f"警告: 特征融合失败: channel mismatch for '{key}'")
                fused[key] = clip_feat
                continue

            sam_res = get_sam_resized(H, W)                   # f32 (B, Cs, H, W)

            if not needs_proj:
                # Pure elementwise add: HBM-bandwidth bound; keep clip in its original
                # dtype (no bf16 round trip) and let XLA fuse it near roofline.
                fused[key] = clip_feat + sam_res.astype(clip_feat.dtype)
                continue

            out_dtype = clip_feat.dtype
            Cout = self.sam_dim
            clip2d = clip_feat.reshape(Bc, Cc, H * W).astype(cdt)     # free reshape
            sam2d = sam_res.reshape(Bc, Cs, H * W).astype(cdt)        # free reshape
            w_c = self._get_weight(key)

            csz = np.dtype(cdt).itemsize
            osz = np.dtype(out_dtype).itemsize
            bytes_per_px = Cc * csz + Cout * csz + Cout * osz
            th = _pick_row_tile(H, W, bytes_per_px=bytes_per_px,
                                batch=Bc, vmem_cap=vmem_cap)

            out2d = _proj_add_call(clip2d, w_c, sam2d, T=th * W,
                                   out_dtype=out_dtype, vmem_cap=vmem_cap)
            fused[key] = out2d.reshape(Bc, Cout, H, W)                # free reshape
        return fused


# ------------------------------------ main ------------------------------------ #

if __name__ == "__main__":
    root = jax.random.PRNGKey(0)
    k_sam, k1, k2, k3, k4, k_w = jax.random.split(root, 6)

    sam_dim, B, Hin, Win = 32, 2, 8, 8
    clip_dims = {"layer1": 16, "layer3": 48}

    sam_features = jax.random.normal(k_sam, (B, sam_dim, Hin, Win), jnp.float32)
    clip_features = {
        "layer1": jax.random.normal(k1, (B, 16, 16, 16), jnp.float32),       # proj + resize
        "layer2": jax.random.normal(k2, (B, sam_dim, 8, 8), jnp.float32),    # plain add
        "layer3": jax.random.normal(k3, (B, 48, 8, 8), jnp.float32),         # proj only
        "layer4": jax.random.normal(k4, (B, sam_dim, 16, 16), jnp.float32),  # resize only
    }

    module = SAMFeatureFusionPallas(sam_dim=sam_dim, clip_dims=clip_dims,
                                    fusion_type="add", key=k_w)
    fused = jax.block_until_ready(module(sam_features, clip_features))

    # ---- pure-jnp f32 reference of the same math ----
    def resize_ref(x, H, W):
        Hi, Wi = x.shape[2], x.shape[3]
        Ah = jnp.asarray(_bilinear_matrix(H, Hi))   # (H, Hin)
        Aw = jnp.asarray(_bilinear_matrix(W, Wi))   # (W, Win)
        return jnp.einsum("uh,bchw,vw->bcuv", Ah, x, Aw)

    sam16 = resize_ref(sam_features, 16, 16)
    w1 = module.projections["layer1"]
    w3 = module.projections["layer3"]
    ref = {
        "layer1": jnp.einsum("oc,bchw->bohw", w1, clip_features["layer1"]) + sam16,
        "layer2": clip_features["layer2"] + sam_features,
        "layer3": jnp.einsum("oc,bchw->bohw", w3, clip_features["layer3"]) + sam_features,
        "layer4": clip_features["layer4"] + sam16,
    }
    # bf16 projection paths get a loose tolerance; pure f32 add / resize-add are tight.
    tol = {"layer1": 5e-2, "layer2": 1e-6, "layer3": 5e-2, "layer4": 1e-4}
    for name in clip_features:
        got = fused[name].astype(jnp.float32)
        want = ref[name]
        assert got.shape == want.shape, (name, got.shape, want.shape)
        err = float(jnp.max(jnp.abs(got - want)))
        assert bool(jnp.allclose(got, want, atol=tol[name], rtol=tol[name])), \
            f"{name}: max abs err {err}"

    print("KERNEL_OK")
</pallas_src>

<mosaic_0001>
module attributes {stable_mosaic.version = 11 : i64} {
  func.func @_proj_add_kernel(%arg0: i32, %arg1: i32, %arg2: memref<1x16x128xbf16, #tpu.memory_space<vmem>>, %arg3: memref<32x16xbf16, #tpu.memory_space<vmem>>, %arg4: memref<1x32x128xbf16, #tpu.memory_space<vmem>>, %arg5: memref<1x32x128xf32, #tpu.memory_space<vmem>>) attributes {dimension_semantics = [#tpu.dimension_semantics<parallel>, #tpu.dimension_semantics<parallel>], iteration_bounds = array<i64: 2, 2>, scalar_prefetch = 0 : i64, scratch_operands = 0 : i64, tpu.core_type = #tpu.core_type<tc>, window_params = [{transform_indices = @transform_0, window_bounds = array<i64: 1, 16, 128>}, {pipeline_mode = #tpu.pipeline_mode<synchronous>, transform_indices = @transform_1, window_bounds = array<i64: 32, 16>}, {transform_indices = @transform_2, window_bounds = array<i64: 1, 32, 128>}, {transform_indices = @transform_3, window_bounds = array<i64: 1, 32, 128>}]} {
    %c0 = arith.constant 0 : index
    %c0_0 = arith.constant 0 : index
    %0 = vector.load %arg3[%c0, %c0_0] : memref<32x16xbf16, #tpu.memory_space<vmem>>, vector<32x16xbf16>
    %c0_1 = arith.constant 0 : index
    %c0_2 = arith.constant 0 : index
    %c0_3 = arith.constant 0 : index
    %1 = vector.load %arg2[%c0_1, %c0_2, %c0_3] : memref<1x16x128xbf16, #tpu.memory_space<vmem>>, vector<1x16x128xbf16>
    %2 = vector.shape_cast %1 : vector<1x16x128xbf16> to vector<16x128xbf16>
    %cst = arith.constant dense<0.000000e+00> : vector<32x128xf32>
    %3 = tpu.matmul %0, %2, %cst {dimension_numbers = #tpu.dot_dimension_numbers<[1], [0], [0], [1], [0, 0, 1, 1], [], []>} : vector<32x16xbf16>, vector<16x128xbf16>, vector<32x128xf32> -> vector<32x128xf32>
    %c0_4 = arith.constant 0 : index
    %c0_5 = arith.constant 0 : index
    %c0_6 = arith.constant 0 : index
    %4 = vector.load %arg4[%c0_4, %c0_5, %c0_6] : memref<1x32x128xbf16, #tpu.memory_space<vmem>>, vector<1x32x128xbf16>
    %5 = vector.shape_cast %4 : vector<1x32x128xbf16> to vector<32x128xbf16>
    %6 = arith.extf %5 : vector<32x128xbf16> to vector<32x128xf32>
    %7 = arith.addf %3, %6 : vector<32x128xf32>
    %c0_7 = arith.constant 0 : index
    %c0_8 = arith.constant 0 : index
    %c0_9 = arith.constant 0 : index
    %8 = vector.load %arg5[%c0_7, %c0_8, %c0_9] : memref<1x32x128xf32, #tpu.memory_space<vmem>>, vector<1x32x128xf32>
    %9 = vector.shape_cast %8 : vector<1x32x128xf32> to vector<32x128xf32>
    %10 = vector.shape_cast %7 : vector<32x128xf32> to vector<1x32x128xf32>
    tpu.vector_store %arg5[%c0_7, %c0_8, %c0_9], %10 {strides = array<i32>} : memref<1x32x128xf32, #tpu.memory_space<vmem>>, vector<1x32x128xf32>,
    return
  }
  func.func @transform_0(%arg0: i32, %arg1: i32) -> (i32, i32, i32) {
    %c0_i32 = arith.constant 0 : i32
    %c0_i32_0 = arith.constant 0 : i32
    return %arg0, %c0_i32, %arg1 : i32, i32, i32
  }
  func.func @transform_1(%arg0: i32, %arg1: i32) -> (i32, i32) {
    %c0_i32 = arith.constant 0 : i32
    %c0_i32_0 = arith.constant 0 : i32
    %c0_i32_1 = arith.constant 0 : i32
    return %c0_i32, %c0_i32_0 : i32, i32
  }
  func.func @transform_2(%arg0: i32, %arg1: i32) -> (i32, i32, i32) {
    %c0_i32 = arith.constant 0 : i32
    %c0_i32_0 = arith.constant 0 : i32
    return %arg0, %c0_i32, %arg1 : i32, i32, i32
  }
  func.func @transform_3(%arg0: i32, %arg1: i32) -> (i32, i32, i32) {
    %c0_i32 = arith.constant 0 : i32
    %c0_i32_0 = arith.constant 0 : i32
    return %arg0, %c0_i32, %arg1 : i32, i32, i32
  }
}

</mosaic_0001>

<bundles_post_ra>
// kernel: tpu_custom_call.1
= control target key start
LH: loop header
LB: loop body
LE: loop exit
PB: predicated region body
PF: predicated region fallthrough
CT: control target
= control target key end

     0   :  { %s1054_s0 = inlined_call_operand.hbm [shape: bf16[2,16,256], index: 0, kind: input, shape index: {}]   ;;  %s1055_s1 = inlined_call_operand.vmem [shape: bf16[32,16], index: 1, kind: input, shape index: {}]   ;;  %s1056_s2 = inlined_call_operand.hbm [shape: bf16[2,32,256], index: 2, kind: input, shape index: {}]   ;;  %s1057_s3 = inlined_call_operand.hbm [shape: f32[2,32,256], index: 3, kind: output, shape index: {}]  }
   0x1   :  { %1063 = sst [smem:[#allocation15_spill]] %s1054_s0 }
   0x2   :  { %8 = vsyncpa [#allocation3], 0 }
   0x3   :  { %10 = vsyncpa [#allocation3 + $0x1], 0 }
   0x4   :  { %11 = vsyncpa [#allocation6], 0 }
   0x5   :  { %13 = vsyncpa [#allocation6 + $0x1], 0 }
   0x6   :  { %14 = vsyncpa [#allocation4], 0 }
   0x7   :  { %16 = vsyncpa [#allocation4 + $0x1], 0  ;;  %s795_s12 = smov 0   ;;  %s797_s13 = smov 0  }
   0x8   :  { %s799_s14 = smov 0   ;;  %s801_s15 = smov 0  }
   0x9   :  { %s803_s16 = smov 0   ;;  %s805_s17 = smov 0  }
   0xa   :  { %s807_s18 = smov 0   ;;  %s809_s19 = smov 0  }
   0xb LB: > { %1064 = sst [smem:[#allocation11_spill]] %s744_s14  ;;  %s468_s20 = sadd.s32 4294967295, %s764_s19   ;;  %s764_s19 = sphi %s809_s19, %s22_s19   ;;  %s760_s18 = sphi %s807_s18, %s1087_s18   ;;  %s756_s17 = sphi %s805_s17, %s1086_s17   ;;  %s752_s16 = sphi %s803_s16, %s1085_s16   ;;  %s748_s15 = sphi %s801_s15, %s1084_s15   ;;  %s744_s14 = sphi %s799_s14, %s1079_s14   ;;  %s740_s13 = sphi %s797_s13, %s1083_s13   ;;  %s736_s12 = sphi %s795_s12, %s1082_s12  }
   0xc   : > { %s469_s21 = sadd.s32 4294967294, %s764_s19   ;;  %s31_s22 = sadd.s32 1, %s756_s17 }
   0xd   : > { %s34_s23 = sadd.s32 1, %s760_s18  ;;  %p32_p0 = scmp.ge.s32.totalorder %s31_s22, 2 }
   0xe   : > { %s43_s24 = sadd.s32 1, %s744_s14  ;;  %p50_p1 = scmp.ne.s32.totalorder %s744_s14, %s740_s13 }
   0xf   : > { %p51_p2 = scmp.eq.s32.totalorder %s764_s19, 0  ;;  %s1089_s22 = smov (%p32_p0, %s31_s22), 0 }
  0x10   : > { %1065 = sst [smem:[#allocation12_spill]] %s1089_s22  ;;  %s1091_s23 = smov (!%p32_p0, %s34_s23), %s760_s18 }
  0x11   : > { %s39_s25 = ssub.s32 %s756_s17, %s1089_s22  ;;  %p848_p3 = por %p51_p2, %p50_p1 }
  0x12   : > { %p36_p4 = scmp.ge.s32.totalorder %s1091_s23, 2  ;;  %p56_p5 = scmp.ne.s32.totalorder %s740_s13, %s736_s12 }
  0x13   : > { %p57_p6 = scmp.eq.s32.totalorder %s468_s20, 0  ;;  %p131_p7 = scmp.eq.s32.totalorder %s468_s20, 3 }
  0x14   : > { %s1093_s23 = smov (%p36_p4, %s1091_s23), 0  ;;  %p137_p10 = scmp.eq.s32.totalorder %s469_s21, 3 }
  0x15   : > { %1067 = sst [smem:[#allocation13_spill]] %s1093_s23  ;;  %p856_p8 = por %p57_p6, %p56_p5 }
  0x16   : > { %p860_p9 = por %p131_p7, %p50_p1  ;;  %s38_s29 = ssub.s32 %s760_s18, %s1093_s23 }
  0x17   : > { %s1068_s27 = scalar_select %p856_p8, 1, 0 }
  0x18   : > { %s1069_s28 = scalar_select %p860_p9, 1, 0 }
  0x19   : > { %s40_s30 = sor.u32 %s39_s25, %s38_s29  ;;  %p866_p12 = por %p137_p10, %p56_p5 }
  0x1a   : > { %p41_p11 = scmp.eq.s32.totalorder %s40_s30, 0  ;;  %p527_p13 = scmp.lt.s32.totalorder %s764_s19, 4 }
  0x1b   : > { %s1070_s4 = scalar_select %p866_p12, 1, 0 }
  0x1c   : > { %s872_s5 = sand.u32 1, %s744_s14   ;;  %s473_s8 = sshll.u32 %s760_s18, 2 }
  0x1d   : > { %s875_s6 = scalar_select %p41_p11, %s744_s14, %s43_s24  }
  0x1e   : > { %s472_s7 = sshll.u32 %s872_s5, 3  ;;  %s169_s9 = sadd.s32 %s756_s17, %s473_s8 }
  0x1f   : > { %1071 = sst [smem:[#allocation14_spill]] %s875_s6  ;;  %s164_s10 = scalar_lea.vmem [#allocation2], %s472_s7 }
  0x20   : > { %s172_s11 = sshll.u32 %s164_s10, 4  ;;  %s474_s20 = sshll.u32 %s169_s9, 6  ;;  %s880_s11 = int_to_ptr.vmem [resolvable:$true] %s172_s11 }
  0x21   : > { %s1072_s0 = sld [smem:[#allocation15_spill]]  ;;  %p889_p0 = pnand %p527_p13, %p848_p3 }
  0x22   : > { %s161_s30 = scalar_lea.sflag [#allocation3], %s872_s5 }
  0x23   : > { %p604_p2 = pneg %p889_p0 }
  0x27   : > { %s885_s29 = scalar_lea.hbm %s1072_s0, %s474_s20  ;;  %s607_s9 = scalar_lea.hbm %s1072_s0, 512 }
  0x28   : > { %s602_s7 = scalar_lea.hbm %s885_s29, 128  ;;  %p608_p3 = scmp.lt.u32.totalorder %s885_s29, %s1072_s0 }
  0x29   : > { %p603_p1 = scmp.ne.s32.totalorder %s885_s29, %s602_s7  ;;  %p609_p6 = scmp.lt.u32.totalorder %s607_s9, %s602_s7 }
  0x2a   : > { %p611_p10 = scmp.lt.u32.totalorder %s602_s7, %s885_s29 }
  0x2b   : > { %p605_p4 = pnand %p604_p2, %p603_p1  ;;  %p610_p7 = por %p609_p6, %p608_p3 }
  0x2d   : > { %p606_p5 = pneg %p605_p4  ;;  %p612_p11 = por %p611_p10, %p610_p7 }
  0x2f   : > { %p613_p13 = pnand %p612_p11, %p606_p5 }
  0x31   : > { %616 = shalt.err (!%p613_p13)
}
  0x32   : > { %s617_s21 = scalar_lea.vmem %s880_s11, 128  ;;  %s766_s25 = smov [#allocation2]  }
  0x33   : > { %p618_p1 = scmp.ne.s32.totalorder %s880_s11, %s617_s21  ;;  %s622_s26 = sshll.u32 %s766_s25, 4  ;;  %s623_s26 = int_to_ptr.vmem [resolvable:$false] %s622_s26 }
  0x34   : > { %s624_s8 = scalar_lea.vmem %s623_s26, 256  ;;  %p625_p9 = scmp.lt.s32.totalorder %s880_s11, %s623_s26 }
  0x35   : > { %p620_p4 = pnand %p618_p1, %p604_p2  ;;  %p626_p3 = scmp.lt.s32.totalorder %s624_s8, %s617_s21 }
  0x37   : > { %p621_p12 = pneg %p620_p4  ;;  %p627_p6 = por %p626_p3, %p625_p9 }
  0x39   : > { %p628_p7 = pnand %p627_p6, %p621_p12 }
  0x3b   : > { %631 = shalt.err (!%p628_p7)
}
  0x3c   : > { %s767_s7 = smov 128   ;;  %s768_s9 = smov 64  }
  0x3d   : > { %s769_s10 = smov 4   ;;  %p478_p9 = scmp.ge.s32.totalorder %s764_s19, 1 }
  0x3e   : > { %519 = dma.hbm_to_vmem [thread:$0]  (!%p889_p0), %s885_s29, 128, %s880_s11, %s161_s30, %s767_s7, %s768_s9, %s769_s10  }
  0x3f   : > { %p202_p12 = scmp.lt.s32.totalorder %s764_s19, 5  ;;  %s475_s20 = sshll.u32 %s872_s5, 4 }
  0x40   : > { %s476_s25 = sshll.u32 %s760_s18, 3  ;;  %s186_s26 = scalar_lea.vmem [#allocation5], %s475_s20 }
  0x41   : > { %p927_p5 = pnand %p478_p9, %p202_p12  ;;  %s194_s8 = sshll.u32 %s186_s26, 4  ;;  %s933_s8 = int_to_ptr.vmem [resolvable:$true] %s194_s8 }
  0x42   : > { %s191_s0 = sadd.s32 %s756_s17, %s476_s25  ;;  %s183_s11 = scalar_lea.sflag [#allocation6], %s872_s5 }
  0x43   : > { %s477_s23 = sshll.u32 %s191_s0, 6  ;;  %s637_s0 = scalar_lea.hbm %s1056_s2, 1024 }
  0x44   : > { %s938_s14 = scalar_lea.hbm %s1056_s2, %s477_s23 }
  0x45   : > { %s632_s29 = scalar_lea.hbm %s938_s14, 256  ;;  %p638_p1 = scmp.lt.u32.totalorder %s938_s14, %s1056_s2 }
  0x46   : > { %p633_p10 = scmp.ne.s32.totalorder %s938_s14, %s632_s29  ;;  %p639_p4 = scmp.lt.u32.totalorder %s637_s0, %s632_s29 }
  0x47   : > { %p641_p6 = scmp.lt.u32.totalorder %s632_s29, %s938_s14 }
  0x48   : > { %p635_p11 = pnand %p633_p10, %p604_p2  ;;  %p640_p3 = por %p639_p4, %p638_p1 }
  0x4a   : > { %p636_p13 = pneg %p635_p11  ;;  %p642_p7 = por %p641_p6, %p640_p3 }
  0x4c   : > { %p643_p9 = pnand %p642_p7, %p636_p13 }
  0x4e   : > { %646 = shalt.err (!%p643_p9)
}
  0x4f   : > { %s647_s22 = scalar_lea.vmem %s933_s8, 256  ;;  %s770_s23 = smov [#allocation5]  }
  0x50   : > { %p648_p12 = scmp.ne.s32.totalorder %s933_s8, %s647_s22  ;;  %s652_s6 = sshll.u32 %s770_s23, 4  ;;  %s653_s6 = int_to_ptr.vmem [resolvable:$false] %s652_s6 }
  0x51   : > { %s654_s30 = scalar_lea.vmem %s653_s6, 512  ;;  %p655_p8 = scmp.lt.s32.totalorder %s933_s8, %s653_s6 }
  0x52   : > { %p650_p10 = pnand %p648_p12, %p604_p2  ;;  %p656_p1 = scmp.lt.s32.totalorder %s654_s30, %s647_s22 }
  0x54   : > { %p651_p11 = pneg %p650_p10  ;;  %p657_p4 = por %p656_p1, %p655_p8 }
  0x56   : > { %p658_p3 = pnand %p657_p4, %p651_p11 }
  0x58   : > { %661 = shalt.err (!%p658_p3)
}
  0x59   : > { %522 = dma.hbm_to_vmem [thread:$0]  (!%p889_p0), %s938_s14, 256, %s933_s8, %s183_s11, %s767_s7, %s768_s9, %s769_s10  }
  0x5a   : > { %206 = sbr.rel (%p927_p5) target bundleno = 339 (0x153), region = 32  ;;  %s972_s29 = sand.u32 (!%p927_p5), 1, %s740_s13  }
  0x5b   : > { %s479_s20 = sshll.u32 (!%p927_p5), %s972_s29, 3  ;;  %s209_s0 = scalar_lea.sflag (!%p927_p5), [#allocation3], %s972_s29 }
  0x5c   : > { %s212_s24 = scalar_lea.vmem (!%p927_p5), [#allocation2], %s479_s20  ;;  %p1075_p8 = scmp.ne.s32.totalorder (!%p927_p5), %s1068_s27, 0 }
  0x61   : > { %723 = dma.done.wait (%p1075_p8), %s209_s0, 128  }
  0x62   : > { %725 = vsyncadd (%p1075_p8), %s209_s0, 4294967168  ;;  %s480_s14 = sshll.u32 %s972_s29, 4  ;;  %s218_s5 = scalar_lea.sflag [#allocation6], %s972_s29 }
  0x63   : > { %s221_s7 = scalar_lea.vmem [#allocation5], %s480_s14 }
  0x64   : > { %727 = dma.done.wait (%p1075_p8), %s218_s5, 256  }
  0x65   : > { %729 = vsyncadd (%p1075_p8), %s218_s5, 4294967040  ;;  %v599_v0 = vld [vmem:[%s212_s24] sm:$0xff]   ;;  %vm280_vm0 = vcmask 130048   ;;  %s488_s27 = sshll.u32 %s752_s16, 3  ;;  %s481_s11 = sshll.u32 %s972_s29, 5  ;;  %v493_v4 = vld [vmem:[%s221_s7] sm:$0xff]  }
  0x66   : > { %v600_v1 = vld [vmem:[%s1055_s1] sm:$0xff]   ;;  %504 = vmatprep.subr.bf16.mxu0 %v599_v0  ;;  %v601_v2 = vld [vmem:[%s1055_s1 + $0x8] sm:$0xff]   ;;  %s352_s25 = sadd.s32 %s748_s15, %s488_s27  ;;  %v494_v6 = vunpack.c.l.bf16 %v493_v4  ;;  %s248_s26 = scalar_lea.vmem [#allocation7], %s481_s11  ;;  %v495_v9 = vunpack.c.h.bf16 %v493_v4 }
  0x67   : > { %505 = vmatpush3.bf16.msra.mxu0 %v599_v0  ;;  %506 = vmatprep.mubr.msk.bf16.mxu0 %vm280_vm0, %v600_v1  ;;  %v500_v3 = vld [vmem:[%s221_s7 + $0x8] sm:$0xff]   ;;  %s355_s22 = sshll.u32 %s248_s26, 4  ;;  %s489_s23 = sshll.u32 %s352_s25, 7  ;;  %s995_s22 = int_to_ptr.vmem [resolvable:$true] %s355_s22 }
  0x68   : > { %v498_v5 = vunpack.c.l.bf16 %v500_v3  ;;  %v499_v7 = vunpack.c.h.bf16 %v500_v3  ;;  %s1000_s6 = scalar_lea.hbm %s1057_s3, %s489_s23  ;;  %s341_s30 = scalar_lea.sflag [#allocation4], %s972_s29 }
  0x69   : > { %s662_s20 = scalar_lea.vmem %s995_s22, 512  ;;  %p1076_p2 = scmp.ne.s32.totalorder %s1069_s28, 0 }
  0x6a   : > { %507 = vmatmul.mubr.msk.bf16.vlgmr.msra.gmra.mrb[0].mxu0 %vm280_vm0, %v601_v2  ;;  %p663_p0 = scmp.ne.s32.totalorder %s995_s22, %s662_s20  ;;  %s771_s0 = smov [#allocation7]  }
  0x6b   : > { %s666_s24 = sshll.u32 %s771_s0, 4  ;;  %s667_s24 = int_to_ptr.vmem [resolvable:$false] %s666_s24 }
  0x6c   : > { %p664_p5 = pnand %p663_p0, %p1076_p2  ;;  %s668_s14 = scalar_lea.vmem %s667_s24, 1024 }
  0x6d   : > { %p669_p6 = scmp.lt.s32.totalorder %s995_s22, %s667_s24  ;;  %p670_p7 = scmp.lt.s32.totalorder %s668_s14, %s662_s20 }
  0x6e   : > { %p665_p13 = pneg %p664_p5 }
  0x6f   : > { %p671_p9 = por %p670_p7, %p669_p6 }
  0x71   : > { %p672_p12 = pnand %p671_p9, %p665_p13 }
 0x13d   : > { %v508_v8 = vpop.f32.mrb[0].mxu0 }
 0x13e   : > { %v330_v10 = vadd.f32 %v508_v8, %v498_v5  ;;  %v321_v11 = vpop.f32.mrb[1].mxu0 }
 0x13f   : > { %v322_v12 = vadd.f32 %v494_v6, %v321_v11  ;;  %v509_v13 = vpop.f32.mrb[2].mxu0 }
 0x140   : > { %338 = vst [vmem:[%s248_s26 + $0x10] sm:$0xff] %v330_v10  ;;  %v333_v14 = vadd.f32 %v509_v13, %v499_v7  ;;  %v324_v15 = vpop.f32.mrb[3].mxu0 }
 0x141   : > { %336 = vst [vmem:[%s248_s26] sm:$0xff] %v322_v12  ;;  %v325_v16 = vadd.f32 %v495_v9, %v324_v15 }
 0x142   : > { %339 = vst [vmem:[%s248_s26 + $0x18] sm:$0xff] %v333_v14 }
 0x143   : > { %337 = vst [vmem:[%s248_s26 + $0x8] sm:$0xff] %v325_v16 }
 0x144   : > { %675 = shalt.err (!%p672_p12)
}
 0x145   : > { %s676_s5 = scalar_lea.hbm %s1000_s6, 512  ;;  %s680_s10 = scalar_lea.hbm %s1057_s3, 2048 }
 0x146   : > { %p677_p10 = scmp.ne.s32.totalorder %s1000_s6, %s676_s5  ;;  %p681_p4 = scmp.lt.u32.totalorder %s1000_s6, %s1057_s3 }
 0x147   : > { %p682_p3 = scmp.lt.u32.totalorder %s680_s10, %s676_s5  ;;  %p684_p0 = scmp.lt.u32.totalorder %s676_s5, %s1000_s6 }
 0x148   : > { %p678_p11 = pnand %p677_p10, %p1076_p2 }
 0x149   : > { %p683_p8 = por %p682_p3, %p681_p4 }
 0x14a   : > { %p679_p1 = pneg %p678_p11 }
 0x14b   : > { %p685_p5 = por %p684_p0, %p683_p8 }
 0x14d   : > { %p686_p13 = pnand %p685_p5, %p679_p1 }
 0x14f   : > { %689 = shalt.err (!%p686_p13)
}
 0x150   : > { %s772_s27 = smov 128   ;;  %s773_s11 = smov 256  }
 0x151   : > { %s774_s25 = smov 8  }
 0x152   : > { %514 = dma.vmem_to_hbm [thread:$0]  (%p1076_p2), %s995_s22, 512, %s1000_s6, %s341_s30, %s772_s27, %s773_s11, %s774_s25  }
 0x153 PF: > { %p528_p6 = scmp.ge.s32.totalorder %s764_s19, 2  ;;  %s370_s26 = sand.u32 1, %s736_s12  }
 0x154   : > { %p1077_p7 = scmp.ne.s32.totalorder %s1070_s4, 0  ;;  %s371_s23 = scalar_lea.sflag [#allocation4], %s370_s26 }
 0x156   : > { %p524_p9 = pnand %p528_p6, %p1077_p7 }
 0x158   : > { %731 = dma.done.wait (!%p524_p9), %s371_s23, 512  }
 0x159   : > { %733 = vsyncadd (!%p524_p9), %s371_s23, 4294966784  ;;  %s22_s19 = sadd.s32 1, %s764_s19   ;;  %s1078_s15 = sld [smem:[#allocation11_spill]] }
 0x15a   : > { %p19_p12 = scmp.ge.s32.totalorder %s22_s19, 6   ;;  %s1079_s14 = sld [smem:[#allocation14_spill]] }
 0x15b   : > { %s1080_s28 = sld [smem:[#allocation12_spill]]  ;;  %s1081_s29 = sld [smem:[#allocation13_spill]] }
 0x15c   : > { %s1082_s12 = smov %s740_s13  ;;  %s1085_s16 = smov %s760_s18 }
 0x15d   :  { %21 = sbr.rel (!%p19_p12) target bundleno = 11 (0xb), region = 90 }
 0x15f   : > { %s1083_s13 = smov %s1078_s15  ;;  %s1084_s15 = smov %s756_s17 }
 0x161   : > { %s1086_s17 = smov %s1080_s28  ;;  %s1087_s18 = smov %s1081_s29 }
 0x164   :  { %376 = vsyncpa [#allocation3], 1 }
 0x165   :  { %378 = vsyncpa [#allocation3 + $0x1], 1 }
 0x166   :  { %379 = vsyncpa [#allocation6], 1 }
 0x167   :  { %381 = vsyncpa [#allocation6 + $0x1], 1 }
 0x168   :  { %382 = vsyncpa [#allocation4], 1 }
 0x169   :  { %384 = vsyncpa [#allocation4 + $0x1], 1 }

</bundles_post_ra>
